<compile_context>
chip_gen: v5e
topology: v5e:2x2
jax: 0.10.0
libtpu: 0.0.40
codegen_flags: <defaults>
</compile_context>

<pallas_src>
import functools

import jax
import jax.numpy as jnp
from jax.experimental import pallas as pl
from jax.experimental.pallas import tpu as pltpu


HIDDEN = 64          # fc1 / fc2 width from the PyTorch module
HIDDEN_PAD = 128     # padded to one full lane tile
TM_CAP = 1024        # max batch-tile rows per grid step


def _round_up(x, m):
    return (x + m - 1) // m * m


def _cdiv(a, b):
    return -(-a // b)


# ----------------------------------------------------------------------------
# Fused Pallas kernel:
#   tanh(tanh(x@W1+b1)@W2+b2) @ W_head + b_head  ->  [mu | exp(log_sigma)]
# ----------------------------------------------------------------------------
def _actor_kernel(x_ref, w1_ref, b1_ref, w2_ref, b2_ref, wh_ref, bh_ref,
                  out_ref, *, n_a, head_out):
    # bf16 operands, f32 MXU accumulation.
    x = x_ref[...].astype(jnp.bfloat16)
    h = jnp.tanh(jnp.dot(x, w1_ref[...], preferred_element_type=jnp.float32)
                 + b1_ref[...])
    h = jnp.tanh(jnp.dot(h.astype(jnp.bfloat16), w2_ref[...],
                         preferred_element_type=jnp.float32) + b2_ref[...])
    head = (jnp.dot(h.astype(jnp.bfloat16), wh_ref[...],
                    preferred_element_type=jnp.float32) + bh_ref[...])
    # Lanes [0, n_a) carry mu (identity); lanes [n_a, ...) carry log_sigma
    # (padding lanes hold exp(0)=1 but are never stored).
    lane = jax.lax.broadcasted_iota(jnp.int32, head.shape, dimension=1)
    head = jnp.where(lane < n_a, head, jnp.exp(head))
    # Store only the real lanes (mu | sigma); padded lanes never reach HBM.
    out_ref[...] = head[:, :head_out]


# ----------------------------------------------------------------------------
# Parameter init (PyTorch nn.Linear semantics) + one-time packing
# ----------------------------------------------------------------------------
def init_actor_params(key, n_s, n_a):
    ks = jax.random.split(key, 8)

    def linear_init(kw, kb, out_f, in_f):
        bound = 1.0 / float(in_f) ** 0.5
        w = jax.random.uniform(kw, (out_f, in_f), jnp.float32, -bound, bound)
        b = jax.random.uniform(kb, (out_f,), jnp.float32, -bound, bound)
        return w, b

    p = {}
    p["fc1_w"], p["fc1_b"] = linear_init(ks[0], ks[1], HIDDEN, n_s)
    p["fc2_w"], p["fc2_b"] = linear_init(ks[2], ks[3], HIDDEN, HIDDEN)
    p["sigma_w"], p["sigma_b"] = linear_init(ks[4], ks[5], n_a, HIDDEN)
    mu_w, mu_b = linear_init(ks[6], ks[7], n_a, HIDDEN)
    p["mu_w"] = mu_w * 0.1          # self.mu.weight.data.mul_(0.1)
    p["mu_b"] = mu_b * 0.0          # self.mu.bias.data.mul_(0.0)
    return p


def pack_actor_params(params, n_s, n_a):
    """One-time packing: (out,in) -> zero-padded bf16 (in_pad, out_pad);
    the mu and sigma heads are fused into one lane-concatenated weight."""
    head_pad = max(128, _round_up(2 * n_a, 128))

    def pack_w(w, in_pad, out_pad, col0=0):
        wt = jnp.transpose(w).astype(jnp.float32)              # (in, out)
        full = (jnp.zeros((in_pad, out_pad), jnp.float32)
                .at[: wt.shape[0], col0: col0 + wt.shape[1]].set(wt))
        return full

    def pack_b(b, out_pad, col0=0):
        return (jnp.zeros((1, out_pad), jnp.float32)
                .at[0, col0: col0 + b.shape[0]].set(b.astype(jnp.float32)))

    # Fused head: mu in lanes [0, n_a), sigma in lanes [n_a, 2*n_a).
    wh = (pack_w(params["mu_w"], HIDDEN_PAD, head_pad, col0=0)
          + pack_w(params["sigma_w"], HIDDEN_PAD, head_pad, col0=n_a))
    bh = (pack_b(params["mu_b"], head_pad, col0=0)
          + pack_b(params["sigma_b"], head_pad, col0=n_a))

    return {
        "w1": pack_w(params["fc1_w"], n_s, HIDDEN_PAD).astype(jnp.bfloat16),
        "b1": pack_b(params["fc1_b"], HIDDEN_PAD),
        "w2": pack_w(params["fc2_w"], HIDDEN_PAD, HIDDEN_PAD).astype(jnp.bfloat16),
        "b2": pack_b(params["fc2_b"], HIDDEN_PAD),
        "wh": wh.astype(jnp.bfloat16),
        "bh": bh,
        "n_s": n_s,
        "n_a": n_a,
    }


# ----------------------------------------------------------------------------
# Forward pass (matches torch Actor.forward: returns (mu, sigma))
# ----------------------------------------------------------------------------
def actor_forward(packed, s):
    M, n_s = s.shape
    assert n_s == packed["n_s"]
    n_a = packed["n_a"]
    head_pad = packed["wh"].shape[1]
    head_out = 2 * n_a

    # Adaptive batch tiling: biggest tile up to TM_CAP, padding bounded by one
    # sublane group per tile; >= 2 grid steps for larger batches so the
    # "parallel" axis can shard across both v7x TensorCores.
    num_tiles = max(1, _cdiv(M, TM_CAP))
    if M >= 64:
        num_tiles = max(num_tiles, 2)
    TM = _round_up(_cdiv(M, num_tiles), 8)
    Mp = TM * num_tiles

    x = s.astype(jnp.float32)
    if Mp != M:
        x = jnp.zeros((Mp, n_s), jnp.float32).at[:M].set(x)

    weight_bytes = (packed["w1"].size + packed["w2"].size + packed["wh"].size) * 2 \
        + (packed["b1"].size + packed["b2"].size + packed["bh"].size) * 4
    cost = pl.CostEstimate(
        flops=2 * Mp * (n_s * HIDDEN_PAD + HIDDEN_PAD * HIDDEN_PAD
                        + HIDDEN_PAD * head_pad),
        transcendentals=Mp * (2 * HIDDEN_PAD + head_pad),
        bytes_accessed=4 * Mp * n_s + 4 * Mp * head_out + weight_bytes,
    )

    kernel = functools.partial(_actor_kernel, n_a=n_a, head_out=head_out)

    out = pl.pallas_call(
        kernel,
        out_shape=jax.ShapeDtypeStruct((Mp, head_out), jnp.float32),
        grid=(num_tiles,),
        in_specs=[
            pl.BlockSpec((TM, n_s), lambda i: (i, 0)),
            pl.BlockSpec(packed["w1"].shape, lambda i: (0, 0)),
            pl.BlockSpec(packed["b1"].shape, lambda i: (0, 0)),
            pl.BlockSpec(packed["w2"].shape, lambda i: (0, 0)),
            pl.BlockSpec(packed["b2"].shape, lambda i: (0, 0)),
            pl.BlockSpec(packed["wh"].shape, lambda i: (0, 0)),
            pl.BlockSpec(packed["bh"].shape, lambda i: (0, 0)),
        ],
        out_specs=pl.BlockSpec((TM, head_out), lambda i: (i, 0)),
        compiler_params=pltpu.CompilerParams(
            dimension_semantics=("parallel",)),
        cost_estimate=cost,
    )(x, packed["w1"], packed["b1"], packed["w2"], packed["b2"],
      packed["wh"], packed["bh"])

    mu = out[:M, :n_a]
    sigma = out[:M, n_a:head_out]
    return mu, sigma


# TODO(synk): choose_action's Normal sampling (torch.distributions) is a
# host/JAX-side op (jax.random.normal on mu/sigma), not a kernel concern.


# Pure-JAX references for numerical sanity checks.
def actor_reference_f32(params, s):
    x = jnp.tanh(s @ params["fc1_w"].T + params["fc1_b"])
    x = jnp.tanh(x @ params["fc2_w"].T + params["fc2_b"])
    mu = x @ params["mu_w"].T + params["mu_b"]
    sigma = jnp.exp(x @ params["sigma_w"].T + params["sigma_b"])
    return mu, sigma


def actor_reference_bf16(params, s):
    # Mirrors the kernel's numerics: bf16 matmul operands, f32 accumulation.
    def mm(a, w):
        return jnp.dot(a.astype(jnp.bfloat16), w.T.astype(jnp.bfloat16),
                       preferred_element_type=jnp.float32)
    x = jnp.tanh(mm(s, params["fc1_w"]) + params["fc1_b"])
    x = jnp.tanh(mm(x, params["fc2_w"]) + params["fc2_b"])
    mu = mm(x, params["mu_w"]) + params["mu_b"]
    sigma = jnp.exp(mm(x, params["sigma_w"]) + params["sigma_b"])
    return mu, sigma


if __name__ == "__main__":
    key = jax.random.PRNGKey(0)
    k_params, k_x = jax.random.split(key)

    batch, N_S, N_A = 2, 16, 4
    params = init_actor_params(k_params, N_S, N_A)
    packed = pack_actor_params(params, N_S, N_A)   # one-time packing
    s = jax.random.normal(k_x, (batch, N_S), jnp.float32)

    mu, sigma = jax.block_until_ready(actor_forward(packed, s))
    assert mu.shape == (batch, N_A) and sigma.shape == (batch, N_A)
    assert jnp.all(jnp.isfinite(mu)) and jnp.all(jnp.isfinite(sigma))

    # Tight check against a bf16-operand / f32-accumulate reference
    # (same numerics as the kernel's matmuls).
    mu_b, sigma_b = jax.block_until_ready(actor_reference_bf16(params, s))
    assert jnp.allclose(mu, mu_b, atol=1e-4, rtol=1e-4), (mu, mu_b)
    assert jnp.allclose(sigma, sigma_b, atol=1e-4, rtol=1e-4), (sigma, sigma_b)

    # Loose sanity check against the full-f32 reference (bf16 operand rounding
    # is the dominant error term here).
    mu_f, sigma_f = jax.block_until_ready(actor_reference_f32(params, s))
    assert jnp.allclose(mu, mu_f, atol=2e-2, rtol=2e-2), (mu, mu_f)
    assert jnp.allclose(sigma, sigma_f, atol=2e-2, rtol=2e-2), (sigma, sigma_f)

    print("KERNEL_OK")
</pallas_src>

<mosaic_0001>
module attributes {stable_mosaic.version = 11 : i64} {
  func.func @_actor_kernel(%arg0: i32, %arg1: memref<8x16xf32, #tpu.memory_space<vmem>>, %arg2: memref<16x128xbf16, #tpu.memory_space<vmem>>, %arg3: memref<1x128xf32, #tpu.memory_space<vmem>>, %arg4: memref<128x128xbf16, #tpu.memory_space<vmem>>, %arg5: memref<1x128xf32, #tpu.memory_space<vmem>>, %arg6: memref<128x128xbf16, #tpu.memory_space<vmem>>, %arg7: memref<1x128xf32, #tpu.memory_space<vmem>>, %arg8: memref<8x8xf32, #tpu.memory_space<vmem>>) attributes {dimension_semantics = [#tpu.dimension_semantics<parallel>], iteration_bounds = array<i64: 1>, scalar_prefetch = 0 : i64, scratch_operands = 0 : i64, tpu.core_type = #tpu.core_type<tc>, window_params = [{transform_indices = @transform_0, window_bounds = array<i64: 8, 16>}, {pipeline_mode = #tpu.pipeline_mode<synchronous>, transform_indices = @transform_1, window_bounds = array<i64: 16, 128>}, {pipeline_mode = #tpu.pipeline_mode<synchronous>, transform_indices = @transform_2, window_bounds = array<i64: 1, 128>}, {pipeline_mode = #tpu.pipeline_mode<synchronous>, transform_indices = @transform_3, window_bounds = array<i64: 128, 128>}, {pipeline_mode = #tpu.pipeline_mode<synchronous>, transform_indices = @transform_4, window_bounds = array<i64: 1, 128>}, {pipeline_mode = #tpu.pipeline_mode<synchronous>, transform_indices = @transform_5, window_bounds = array<i64: 128, 128>}, {pipeline_mode = #tpu.pipeline_mode<synchronous>, transform_indices = @transform_6, window_bounds = array<i64: 1, 128>}, {transform_indices = @transform_7, window_bounds = array<i64: 8, 8>}]} {
    %c0 = arith.constant 0 : index
    %c0_0 = arith.constant 0 : index
    %0 = vector.load %arg1[%c0, %c0_0] : memref<8x16xf32, #tpu.memory_space<vmem>>, vector<8x16xf32>
    %1 = arith.truncf %0 : vector<8x16xf32> to vector<8x16xbf16>
    %c0_1 = arith.constant 0 : index
    %c0_2 = arith.constant 0 : index
    %2 = vector.load %arg2[%c0_1, %c0_2] : memref<16x128xbf16, #tpu.memory_space<vmem>>, vector<16x128xbf16>
    %cst = arith.constant dense<0.000000e+00> : vector<8x128xf32>
    %3 = tpu.matmul %1, %2, %cst {dimension_numbers = #tpu.dot_dimension_numbers<[1], [0], [0], [1], [0, 0, 1, 1], [], []>} : vector<8x16xbf16>, vector<16x128xbf16>, vector<8x128xf32> -> vector<8x128xf32>
    %c0_3 = arith.constant 0 : index
    %c0_4 = arith.constant 0 : index
    %4 = vector.load %arg3[%c0_3, %c0_4] : memref<1x128xf32, #tpu.memory_space<vmem>>, vector<1x128xf32>
    %5 = vector.broadcast %4 : vector<1x128xf32> to vector<8x128xf32>
    %6 = arith.addf %3, %5 : vector<8x128xf32>
    %7 = math.tanh %6 : vector<8x128xf32>
    %8 = arith.truncf %7 : vector<8x128xf32> to vector<8x128xbf16>
    %c0_5 = arith.constant 0 : index
    %c0_6 = arith.constant 0 : index
    %9 = vector.load %arg4[%c0_5, %c0_6] : memref<128x128xbf16, #tpu.memory_space<vmem>>, vector<128x128xbf16>
    %cst_7 = arith.constant dense<0.000000e+00> : vector<8x128xf32>
    %10 = tpu.matmul %8, %9, %cst_7 {dimension_numbers = #tpu.dot_dimension_numbers<[1], [0], [0], [1], [0, 0, 1, 1], [], []>} : vector<8x128xbf16>, vector<128x128xbf16>, vector<8x128xf32> -> vector<8x128xf32>
    %c0_8 = arith.constant 0 : index
    %c0_9 = arith.constant 0 : index
    %11 = vector.load %arg5[%c0_8, %c0_9] : memref<1x128xf32, #tpu.memory_space<vmem>>, vector<1x128xf32>
    %12 = vector.broadcast %11 : vector<1x128xf32> to vector<8x128xf32>
    %13 = arith.addf %10, %12 : vector<8x128xf32>
    %14 = math.tanh %13 : vector<8x128xf32>
    %15 = arith.truncf %14 : vector<8x128xf32> to vector<8x128xbf16>
    %c0_10 = arith.constant 0 : index
    %c0_11 = arith.constant 0 : index
    %16 = vector.load %arg6[%c0_10, %c0_11] : memref<128x128xbf16, #tpu.memory_space<vmem>>, vector<128x128xbf16>
    %cst_12 = arith.constant dense<0.000000e+00> : vector<8x128xf32>
    %17 = tpu.matmul %15, %16, %cst_12 {dimension_numbers = #tpu.dot_dimension_numbers<[1], [0], [0], [1], [0, 0, 1, 1], [], []>} : vector<8x128xbf16>, vector<128x128xbf16>, vector<8x128xf32> -> vector<8x128xf32>
    %c0_13 = arith.constant 0 : index
    %c0_14 = arith.constant 0 : index
    %18 = vector.load %arg7[%c0_13, %c0_14] : memref<1x128xf32, #tpu.memory_space<vmem>>, vector<1x128xf32>
    %19 = vector.broadcast %18 : vector<1x128xf32> to vector<8x128xf32>
    %20 = arith.addf %17, %19 : vector<8x128xf32>
    %21 = tpu.iota {dimensions = array<i32: 1>} : vector<8x128xi32>
    %c4_i32 = arith.constant 4 : i32
    %22 = vector.broadcast %c4_i32 : i32 to vector<8x128xi32>
    %23 = arith.cmpi slt, %21, %22 : vector<8x128xi32>
    %24 = math.exp %20 : vector<8x128xf32>
    %25 = arith.select %23, %20, %24 : vector<8x128xi1>, vector<8x128xf32>
    %26 = vector.extract_strided_slice %25 {offsets = [0, 0], sizes = [8, 8], strides = [1, 1]} : vector<8x128xf32> to vector<8x8xf32>
    %c0_15 = arith.constant 0 : index
    %c0_16 = arith.constant 0 : index
    %27 = vector.load %arg8[%c0_15, %c0_16] : memref<8x8xf32, #tpu.memory_space<vmem>>, vector<8x8xf32>
    tpu.vector_store %arg8[%c0_15, %c0_16], %26 {strides = array<i32>} : memref<8x8xf32, #tpu.memory_space<vmem>>, vector<8x8xf32>,
    return
  }
  func.func @transform_0(%arg0: i32) -> (i32, i32) {
    %c0_i32 = arith.constant 0 : i32
    %c0_i32_0 = arith.constant 0 : i32
    return %arg0, %c0_i32 : i32, i32
  }
  func.func @transform_1(%arg0: i32) -> (i32, i32) {
    %c0_i32 = arith.constant 0 : i32
    %c0_i32_0 = arith.constant 0 : i32
    %c0_i32_1 = arith.constant 0 : i32
    return %c0_i32, %c0_i32_0 : i32, i32
  }
  func.func @transform_2(%arg0: i32) -> (i32, i32) {
    %c0_i32 = arith.constant 0 : i32
    %c0_i32_0 = arith.constant 0 : i32
    %c0_i32_1 = arith.constant 0 : i32
    return %c0_i32, %c0_i32_0 : i32, i32
  }
  func.func @transform_3(%arg0: i32) -> (i32, i32) {
    %c0_i32 = arith.constant 0 : i32
    %c0_i32_0 = arith.constant 0 : i32
    %c0_i32_1 = arith.constant 0 : i32
    return %c0_i32, %c0_i32_0 : i32, i32
  }
  func.func @transform_4(%arg0: i32) -> (i32, i32) {
    %c0_i32 = arith.constant 0 : i32
    %c0_i32_0 = arith.constant 0 : i32
    %c0_i32_1 = arith.constant 0 : i32
    return %c0_i32, %c0_i32_0 : i32, i32
  }
  func.func @transform_5(%arg0: i32) -> (i32, i32) {
    %c0_i32 = arith.constant 0 : i32
    %c0_i32_0 = arith.constant 0 : i32
    %c0_i32_1 = arith.constant 0 : i32
    return %c0_i32, %c0_i32_0 : i32, i32
  }
  func.func @transform_6(%arg0: i32) -> (i32, i32) {
    %c0_i32 = arith.constant 0 : i32
    %c0_i32_0 = arith.constant 0 : i32
    %c0_i32_1 = arith.constant 0 : i32
    return %c0_i32, %c0_i32_0 : i32, i32
  }
  func.func @transform_7(%arg0: i32) -> (i32, i32) {
    %c0_i32 = arith.constant 0 : i32
    %c0_i32_0 = arith.constant 0 : i32
    return %arg0, %c0_i32 : i32, i32
  }
}

</mosaic_0001>

<bundles_post_ra>
// kernel: tpu_custom_call.1
= control target key start
LH: loop header
LB: loop body
LE: loop exit
PB: predicated region body
PF: predicated region fallthrough
CT: control target
= control target key end

     0   :  { %12 = vsyncpa [#allocation3], 0  ;;  %s614_s0 = inlined_call_operand.hbm [shape: f32[8,16], index: 0, kind: input, shape index: {}]   ;;  %s615_s1 = inlined_call_operand.hbm [shape: bf16[16,128], index: 1, kind: input, shape index: {}]   ;;  %s616_s2 = inlined_call_operand.vmem [shape: f32[1,128], index: 2, kind: input, shape index: {}]   ;;  %s617_s3 = inlined_call_operand.hbm [shape: bf16[128,128], index: 3, kind: input, shape index: {}]   ;;  %s618_s4 = inlined_call_operand.vmem [shape: f32[1,128], index: 4, kind: input, shape index: {}]   ;;  %s619_s5 = inlined_call_operand.hbm [shape: bf16[128,128], index: 5, kind: input, shape index: {}]   ;;  %s620_s6 = inlined_call_operand.vmem [shape: f32[1,128], index: 6, kind: input, shape index: {}]   ;;  %s621_s7 = inlined_call_operand.hbm [shape: f32[8,8], index: 7, kind: output, shape index: {}]  }
   0x1   :  { %13 = vsyncpa [#allocation6], 0 }
   0x2   :  { %14 = vsyncpa [#allocation9], 0  ;;  %s31_s26 = sshll.u32 %s615_s1, 4  ;;  %s32_s26 = int_to_ptr.hbm [resolvable:$true] %s31_s26 }
   0x3   :  { %15 = vsyncpa [#allocation4], 0  ;;  %s543_s27 = smov [#allocation5]   ;;  %s21_s8 = sshll.u32 %s614_s0, 4  ;;  %s22_s8 = int_to_ptr.hbm [resolvable:$true] %s21_s8 }
   0x4   :  { %s33_s28 = sshll.u32 %s543_s27, 4  ;;  %s544_s9 = smov 64   ;;  %s34_s28 = int_to_ptr.vmem [resolvable:$true] %s33_s28 }
   0x5   :  { %s545_s10 = smov 4   ;;  %s546_s11 = smov [#allocation2]  }
   0x6   :  { %39 = dma.hbm_to_vmem [thread:$0]  %s32_s26, 128, %s34_s28, [#allocation6], %s544_s9, %s544_s9, %s545_s10  }
   0x7   :  { %s23_s12 = sshll.u32 %s546_s11, 4  ;;  %s46_s15 = sshll.u32 %s617_s3, 4  ;;  %s24_s12 = int_to_ptr.vmem [resolvable:$true] %s23_s12  ;;  %s47_s15 = int_to_ptr.hbm [resolvable:$true] %s46_s15 }
   0x8   :  { %26 = dma.hbm_to_vmem [thread:$0]  %s22_s8, 128, %s24_s12, [#allocation3]  }
   0x9   :  { %s61_s17 = sshll.u32 %s619_s5, 4  ;;  %s547_s18 = smov [#allocation7]   ;;  %s62_s17 = int_to_ptr.hbm [resolvable:$true] %s61_s17 }
   0xa   :  { %s48_s19 = sshll.u32 %s547_s18, 4  ;;  %s548_s0 = smov [#allocation8]   ;;  %s49_s19 = int_to_ptr.vmem [resolvable:$true] %s48_s19 }
   0xb   :  { %54 = dma.hbm_to_vmem [thread:$0]  %s47_s15, 1024, %s49_s19, [#allocation6], %s544_s9, %s544_s9, %s545_s10  }
   0xc   :  { %s63_s20 = sshll.u32 %s548_s0, 4  ;;  %s64_s20 = int_to_ptr.vmem [resolvable:$true] %s63_s20 }
   0xd   :  { %69 = dma.hbm_to_vmem [thread:$0]  %s62_s17, 1024, %s64_s20, [#allocation9], %s544_s9, %s544_s9, %s545_s10  }
   0xe   :  { %535 = dma.done.wait [#allocation3], 128  }
   0xf   :  { %536 = vsyncadd [#allocation3], 4294967168 }
  0x10   :  { %537 = dma.done.wait [#allocation6], 1152  }
  0x11   :  { %538 = vsyncadd [#allocation6], 4294966144 }
  0x12   :  { %539 = dma.done.wait [#allocation9], 1024  }
  0x13   :  { %540 = vsyncadd [#allocation9], 4294966272  ;;  %v382_v0 = vld [vmem:[#allocation5] sm:$0xff]  ;;  %v89_v1 = vld [vmem:[#allocation2] sm:$0xff]  ;;  %vm103_vm0 = vcmask 130048   ;;  %v286_v34 = vlaneseq  ;;  %s549_s24 = smov [#allocation10]  }
  0x14   :  { %v390_v2 = vld [vmem:[#allocation7 + $0x38] sm:$0xff]  ;;  %v90_v3 = vpack.c.bf16 %v89_v1, %v89_v1  ;;  %114 = vmatpush.bf16.msra.mxu0 %v382_v0  ;;  %v389_v4 = vld [vmem:[#allocation7 + $0x30] sm:$0xff]  ;;  %v388_v5 = vld [vmem:[#allocation7 + $0x28] sm:$0xff]  ;;  %s301_s27 = sshll.u32 %s621_s7, 4  ;;  %vm292_vm2 = vcmask 64512   ;;  %s302_s27 = int_to_ptr.hbm [resolvable:$true] %s301_s27 }
  0x15   :  { %190 = vmatpush.bf16.msra.mxu1 %v390_v2  ;;  %v387_v6 = vld [vmem:[#allocation7 + $0x20] sm:$0xff]  ;;  %v386_v7 = vld [vmem:[#allocation7 + $0x18] sm:$0xff]  ;;  %v385_v8 = vld [vmem:[#allocation7 + $0x10] sm:$0xff]  ;;  %v287_v36 = vand.u32 127, %v286_v34 }
  0x16   :  { %v384_v9 = vld [vmem:[#allocation7 + $0x8] sm:$0xff]  ;;  %v383_v10 = vld [vmem:[#allocation7] sm:$0xff]  ;;  %v398_v11 = vld [vmem:[#allocation8 + $0x38] sm:$0xff] }
  0x17   :  { %317 = vmatmul.msk.bf16.vlgmr.msra.gmra.mxu0 %vm103_vm0, %v90_v3  ;;  %273 = vmatpush.bf16.msra.mxu2 %v398_v11  ;;  %v397_v12 = vld [vmem:[#allocation8 + $0x30] sm:$0xff]  ;;  %v396_v13 = vld [vmem:[#allocation8 + $0x28] sm:$0xff]  ;;  %v395_v14 = vld [vmem:[#allocation8 + $0x20] sm:$0xff]  ;;  %vm288_vm1 = vcmp.lt.s32.totalorder %v287_v36, 4 }
  0x18   :  { %v394_v15 = vld [vmem:[#allocation8 + $0x18] sm:$0xff]  ;;  %v406_v16 = vld [vmem:[%s616_s2] ss:$0 sm:$0xff]  ;;  %v392_v23 = vld [vmem:[#allocation8 + $0x8] sm:$0xff] }
  0x19   :  { %191 = vmatpush.bf16.msra.mxu1 %v389_v4  ;;  %v393_v22 = vld [vmem:[#allocation8 + $0x10] sm:$0xff]  ;;  %v391_v24 = vld [vmem:[#allocation8] sm:$0xff] }
  0x1a   :  { %v407_v25 = vld [vmem:[%s618_s4] ss:$0 sm:$0xff]  ;;  %s299_s4 = sshll.u32 %s549_s24, 4  ;;  %s300_s4 = int_to_ptr.vmem [resolvable:$true] %s299_s4 }
  0x1b   :  { %274 = vmatpush.bf16.msra.mxu2 %v397_v12  ;;  %v408_v31 = vld [vmem:[%s620_s6] ss:$0 sm:$0xff] }
  0x1d   :  { %192 = vmatpush.bf16.msra.mxu1 %v388_v5 }
  0x1f   :  { %275 = vmatpush.bf16.msra.mxu2 %v396_v13 }
  0x21   :  { %193 = vmatpush.bf16.msra.mxu1 %v387_v6 }
  0x23   :  { %276 = vmatpush.bf16.msra.mxu2 %v395_v14 }
  0x25   :  { %194 = vmatpush.bf16.msra.mxu1 %v386_v7 }
  0x27   :  { %277 = vmatpush.bf16.msra.mxu2 %v394_v15 }
  0x29   :  { %195 = vmatpush.bf16.msra.mxu1 %v385_v8 }
  0x2b   :  { %278 = vmatpush.bf16.msra.mxu2 %v393_v22 }
  0x2d   :  { %196 = vmatpush.bf16.msra.mxu1 %v384_v9 }
  0x2f   :  { %279 = vmatpush.bf16.msra.mxu2 %v392_v23 }
  0x31   :  { %197 = vmatpush.bf16.msra.mxu1 %v383_v10 }
  0x33   :  { %280 = vmatpush.bf16.msra.mxu2 %v391_v24 }
  0x94   :  { %v116_v17 = vpop.f32.mrf.mxu0 }
  0x95   :  { %v117_v18 = vadd.f32 %v406_v16, %v116_v17 }
  0x97   :  { %409 = vtanh.f32 %v117_v18 }
  0x9c   :  { %v118_v19 = vpop.f32.mrf.mxu0 }
  0x9d   :  { %v410_v20 = vpop.eup %409 }
  0x9e   :  { %v121_v21 = vpack.c.bf16 %v410_v20, %v410_v20 }
  0xa0   :  { %198 = vmatmul.bf16.vlgmr.msra.gmra.mxu1 %v121_v21 }
 0x11d   :  { %v199_v26 = vpop.f32.mrf.mxu1 }
 0x11e   :  { %v200_v27 = vadd.f32 %v407_v25, %v199_v26 }
 0x120   :  { %411 = vtanh.f32 %v200_v27 }
 0x125   :  { %v201_v28 = vpop.f32.mrf.mxu1 }
 0x126   :  { %v412_v29 = vpop.eup %411 }
 0x127   :  { %v204_v30 = vpack.c.bf16 %v412_v29, %v412_v29 }
 0x129   :  { %281 = vmatmul.bf16.vlgmr.msra.gmra.mxu2 %v204_v30 }
 0x1ac   :  { %v282_v32 = vpop.f32.mrf.mxu2 }
 0x1ad   :  { %v283_v33 = vadd.f32 %v408_v31, %v282_v32 }
 0x1af   :  { %v289_v35 = vmul.f32 1.442695, %v283_v33 }
 0x1b1   :  { %413 = vpow2.f32 %v289_v35 }
 0x1b4   :  { %v284_v37 = vpop.f32.mrf.mxu2 }
 0x1b7   :  { %v414_v38 = vpop.eup %413 }
 0x1b8   :  { %v291_v39 = vsel %vm288_vm1, %v283_v33, %v414_v38 }
 0x1b9   :  { %293 = vst.msk [vmem:[#allocation10] sm:$0xff] %vm292_vm2, %v291_v39 }
 0x1ba   :  { %304 = dma.vmem_to_hbm [thread:$0]  %s300_s4, 128, %s302_s27, [#allocation4]  }
 0x1bb   :  { %541 = dma.done.wait [#allocation4], 128  }
 0x1bc   :  { %542 = vsyncadd [#allocation4], 4294967168 }
 0x1bd   :  { %309 = vsyncpa [#allocation3], 1 }
 0x1be   :  { %310 = vsyncpa [#allocation6], 1 }
 0x1bf   :  { %311 = vsyncpa [#allocation9], 1 }
 0x1c0   :  { %312 = vsyncpa [#allocation4], 1 }

</bundles_post_ra>
